<compile_context>
chip_gen: v6e
topology: v6e:2x2x1
jax: 0.10.0
libtpu: 0.0.40
codegen_flags: <defaults>
</compile_context>

<pallas_src>
import math

import jax
import jax.numpy as jnp
from jax.experimental import pallas as pl
from jax.experimental.pallas import tpu as pltpu

LANE = 128
_VMEM_STEP_BUDGET = 6 << 20   # bytes for one (input + output) pipeline stage


def _transpose_last_kernel(x_ref, o_ref):
    # x_ref: (GBLK, TS, TD) VMEM tile ; o_ref: (GBLK, TD, TS) VMEM tile
    o_ref[...] = jnp.swapaxes(x_ref[...], -2, -1)


def _round_up(a: int, b: int) -> int:
    return ((a + b - 1) // b) * b


def _largest_divisor_leq(n: int, cap: int) -> int:
    cap = max(1, min(n, cap))
    for d in range(cap, 0, -1):
        if n % d == 0:
            return d
    return 1


def _pick_tile(dim: int, max_tile: int) -> int:
    """Full extent for small dims; else a 128-multiple tile (prefer a divisor)."""
    if dim <= max_tile:
        return dim
    for t in range(max_tile, LANE - 1, -LANE):
        if dim % t == 0:
            return t
    return max_tile   # ragged edge block -> masked stores, still correct


def transpose_last(x: jax.Array) -> jax.Array:
    """Pallas equivalent of torch.Tensor.transpose(-2, -1) for ndim >= 2."""
    assert x.ndim >= 2, "TransposeLast needs at least 2 dims"
    *lead, S, D = x.shape

    # Degenerate shapes: the transpose is free / kernel launch would dominate.
    if S == 1 or D == 1:
        return x.reshape(*lead, D, S)
    if x.size < 1024:
        return jnp.swapaxes(x, -2, -1)

    G = math.prod(lead) if lead else 1
    x3 = x.reshape(G, S, D)

    itemsize = jnp.dtype(x.dtype).itemsize
    sub = max(8, 32 // itemsize)     # min sublane multiple for this dtype

    # Per-dim tile cap such that a square (in + out) tile pair fits the budget.
    max_tile_elems = _VMEM_STEP_BUDGET // (2 * itemsize)
    max_tile = max(LANE, (math.isqrt(max_tile_elems) // LANE) * LANE)

    TS = _pick_tile(S, max_tile)
    TD = _pick_tile(D, max_tile)

    # Padded-in-VMEM footprint of one (input + output) slab of the fused G dim.
    slab_bytes = (_round_up(TS, sub) * _round_up(TD, LANE)
                  + _round_up(TD, sub) * _round_up(TS, LANE)) * itemsize
    gmax = max(1, _VMEM_STEP_BUDGET // slab_bytes)
    GBLK = _largest_divisor_leq(G, gmax)     # divisor of G -> no pad/mask on G

    grid_s = pl.cdiv(S, TS)
    grid_d = pl.cdiv(D, TD)
    # v7x megacore: make sure some parallel axis has extent >= 2 when possible.
    if (G // GBLK) * grid_d * grid_s == 1 and G >= 2:
        GBLK = _largest_divisor_leq(G, G // 2)
    grid = (G // GBLK, grid_d, grid_s)   # S-tiles innermost -> sequential writes

    out = pl.pallas_call(
        _transpose_last_kernel,
        out_shape=jax.ShapeDtypeStruct((G, D, S), x.dtype),
        grid_spec=pl.GridSpec(
            grid=grid,
            in_specs=[
                pl.BlockSpec((GBLK, TS, TD), lambda g, di, si: (g, si, di)),
            ],
            # Transpose = swap the S/D tile indices on the output side.
            out_specs=pl.BlockSpec((GBLK, TD, TS), lambda g, di, si: (g, di, si)),
        ),
        compiler_params=pltpu.CompilerParams(
            dimension_semantics=("parallel", "parallel", "parallel"),
        ),
        cost_estimate=pl.CostEstimate(
            flops=0,
            transcendentals=0,
            bytes_accessed=2 * G * S * D * itemsize,
        ),
    )(x3)

    return out.reshape(*lead, D, S)


if __name__ == "__main__":
    key = jax.random.PRNGKey(0)

    # Shapes consistent with the module: batch=2, channels=4, S=16, D=16.
    x = jax.random.normal(key, (2, 4, 16, 16), dtype=jnp.float32)
    out = jax.block_until_ready(transpose_last(x))
    ref = jnp.swapaxes(x, -2, -1)
    assert out.shape == ref.shape, (out.shape, ref.shape)
    assert jnp.array_equal(out, ref), "mismatch vs. reference transpose (small case)"

    # Non-square, non-128-divisible dims: full-extent tiles + divisor-GBLK path.
    x2 = jax.random.normal(jax.random.PRNGKey(1), (2, 3, 48, 20), dtype=jnp.float32)
    out2 = jax.block_until_ready(transpose_last(x2))
    ref2 = jnp.swapaxes(x2, -2, -1)
    assert out2.shape == ref2.shape, (out2.shape, ref2.shape)
    assert jnp.array_equal(out2, ref2), "mismatch vs. reference transpose (ragged case)"

    print("KERNEL_OK")
</pallas_src>

<mosaic_0001>
module attributes {stable_mosaic.version = 11 : i64} {
  func.func @_transpose_last_kernel(%arg0: i32, %arg1: i32, %arg2: i32, %arg3: memref<4x16x16xf32, #tpu.memory_space<vmem>>, %arg4: memref<4x16x16xf32, #tpu.memory_space<vmem>>) attributes {dimension_semantics = [#tpu.dimension_semantics<parallel>, #tpu.dimension_semantics<parallel>, #tpu.dimension_semantics<parallel>], iteration_bounds = array<i64: 2, 1, 1>, scalar_prefetch = 0 : i64, scratch_operands = 0 : i64, tpu.core_type = #tpu.core_type<tc>, window_params = [{transform_indices = @transform_0, window_bounds = array<i64: 4, 16, 16>}, {transform_indices = @transform_1, window_bounds = array<i64: 4, 16, 16>}]} {
    %c0 = arith.constant 0 : index
    %c0_0 = arith.constant 0 : index
    %c0_1 = arith.constant 0 : index
    %0 = vector.load %arg3[%c0, %c0_0, %c0_1] : memref<4x16x16xf32, #tpu.memory_space<vmem>>, vector<4x16x16xf32>
    %1 = tpu.transpose %0, [0, 2, 1] : vector<4x16x16xf32> -> vector<4x16x16xf32>
    %c0_2 = arith.constant 0 : index
    %c0_3 = arith.constant 0 : index
    %c0_4 = arith.constant 0 : index
    %2 = vector.load %arg4[%c0_2, %c0_3, %c0_4] : memref<4x16x16xf32, #tpu.memory_space<vmem>>, vector<4x16x16xf32>
    tpu.vector_store %arg4[%c0_2, %c0_3, %c0_4], %1 {strides = array<i32>} : memref<4x16x16xf32, #tpu.memory_space<vmem>>, vector<4x16x16xf32>,
    return
  }
  func.func @transform_0(%arg0: i32, %arg1: i32, %arg2: i32) -> (i32, i32, i32) {
    %c0_i32 = arith.constant 0 : i32
    return %arg0, %arg2, %arg1 : i32, i32, i32
  }
  func.func @transform_1(%arg0: i32, %arg1: i32, %arg2: i32) -> (i32, i32, i32) {
    %c0_i32 = arith.constant 0 : i32
    return %arg0, %arg1, %arg2 : i32, i32, i32
  }
}

</mosaic_0001>

<bundles_post_ra>
// kernel: tpu_custom_call.1
= control target key start
LH: loop header
LB: loop body
LE: loop exit
PB: predicated region body
PF: predicated region fallthrough
CT: control target
= control target key end

     0   :  { %6 = vsyncpa [#allocation3], 0  ;;  %s793_s0 = inlined_call_operand.hbm [shape: f32[8,16,16], index: 0, kind: input, shape index: {}]   ;;  %s794_s1 = inlined_call_operand.hbm [shape: f32[8,16,16], index: 1, kind: output, shape index: {}]  }
   0x1   :  { %8 = vsyncpa [#allocation3 + $0x1], 0 }
   0x2   :  { %9 = vsyncpa [#allocation4], 0 }
   0x3   :  { %11 = vsyncpa [#allocation4 + $0x1], 0  ;;  %s639_s6 = smov 0   ;;  %s641_s7 = smov 0  }
   0x4   :  { %s643_s8 = smov 0   ;;  %s645_s9 = smov 0  }
   0x5   :  { %s647_s10 = smov 0   ;;  %s649_s11 = smov 0  }
   0x6 LB: > { %s425_s12 = sadd.s32 4294967295, %s621_s11   ;;  %s426_s13 = sadd.s32 4294967294, %s621_s11   ;;  %s621_s11 = sphi %s649_s11, %s17_s11   ;;  %s617_s10 = sphi %s647_s10, %s805_s10   ;;  %s613_s9 = sphi %s645_s9, %s804_s9   ;;  %s609_s8 = sphi %s643_s8, %s803_s8   ;;  %s605_s7 = sphi %s641_s7, %s802_s7   ;;  %s601_s6 = sphi %s639_s6, %s801_s6  }
   0x7   : > { %s36_s14 = sadd.s32 1, %s617_s10  ;;  %s47_s15 = sadd.s32 1, %s609_s8 }
   0x8   : > { %p38_p0 = scmp.ge.s32.totalorder %s36_s14, 2  ;;  %p54_p1 = scmp.ne.s32.totalorder %s609_s8, %s605_s7 }
   0x9   : > { %p55_p2 = scmp.eq.s32.totalorder %s621_s11, 0  ;;  %p60_p3 = scmp.ne.s32.totalorder %s605_s7, %s601_s6 }
   0xa   : > { %s807_s14 = smov (%p38_p0, %s36_s14), 0  ;;  %p61_p5 = scmp.eq.s32.totalorder %s425_s12, 0 }
   0xb   : > { %p680_p4 = por %p55_p2, %p54_p1  ;;  %s40_s17 = ssub.s32 %s617_s10, %s807_s14 }
   0xc   : > { %p88_p6 = scmp.eq.s32.totalorder %s425_s12, 1  ;;  %p45_p7 = scmp.eq.s32.totalorder %s40_s17, 0 }
   0xd   : > { %p686_p8 = por %p61_p5, %p60_p3  ;;  %p94_p10 = scmp.eq.s32.totalorder %s426_s13, 1 }
   0xe   : > { %p690_p9 = por %p88_p6, %p54_p1  ;;  %p458_p13 = scmp.lt.s32.totalorder %s621_s11, 2 }
   0xf   : > { %s695_s20 = scalar_select %p45_p7, %s609_s8, %s47_s15  }
  0x10   : > { %p697_p11 = por %p94_p10, %p60_p3  ;;  %s114_s22 = sand.u32 1, %s609_s8  }
  0x11   : > { %s429_s23 = sshll.u32 %s114_s22, 6  ;;  %s443_s24 = sshll.u32 %s617_s10, 10 }
  0x12   : > { %s128_s27 = scalar_lea.hbm %s793_s0, %s443_s24  ;;  %s118_s28 = scalar_lea.vmem [#allocation2], %s429_s23 }
  0x13   : > { %s129_s29 = sshll.u32 %s118_s28, 4  ;;  %p710_p0 = pnand %p458_p13, %p680_p4  ;;  %s130_s29 = int_to_ptr.vmem [resolvable:$true] %s129_s29 }
  0x14   : > { %p433_p1 = scmp.ge.s32.totalorder %s621_s11, 1  ;;  %s115_s2 = scalar_lea.sflag [#allocation3], %s114_s22 }
  0x15   : > { %p515_p2 = pneg %p710_p0  ;;  %s526_s3 = scalar_lea.vmem %s130_s29, 1024 }
  0x16   : > { %p527_p3 = scmp.ne.s32.totalorder %s130_s29, %s526_s3  ;;  %s623_s4 = smov [#allocation2]  }
  0x17   : > { %s531_s5 = sshll.u32 %s623_s4, 4  ;;  %s532_s5 = int_to_ptr.vmem [resolvable:$false] %s531_s5 }
  0x18   : > { %p529_p5 = pnand %p527_p3, %p515_p2  ;;  %s533_s12 = scalar_lea.vmem %s532_s5, 2048 }
  0x19   : > { %p534_p7 = scmp.lt.s32.totalorder %s130_s29, %s532_s5  ;;  %p535_p10 = scmp.lt.s32.totalorder %s533_s12, %s526_s3 }
  0x1a   : > { %p530_p6 = pneg %p529_p5 }
  0x1b   : > { %p536_p12 = por %p535_p10, %p534_p7 }
  0x1d   : > { %p537_p4 = pnand %p536_p12, %p530_p6 }
  0x1f   : > { %540 = shalt.err (!%p537_p4)
}
  0x20   : > { %s624_s13 = smov 128   ;;  %s625_s15 = smov 8  }
  0x21   : > { %453 = dma.hbm_to_vmem [thread:$0]  (!%p710_p0), %s128_s27, 1024, %s130_s29, %s115_s2, %s624_s13, %s624_s13, %s625_s15  }
  0x22   : > { %p137_p13 = scmp.lt.s32.totalorder %s621_s11, 3 }
  0x24   : > { %p138_p2 = pnand %p433_p1, %p137_p13 }
  0x25   : > { %s723_s16 = sand.u32 (!%p138_p2), 1, %s605_s7  }
  0x26   : > { %141 = sbr.rel (%p138_p2) target bundleno = 196 (0xc4), region = 24  ;;  %s434_s17 = sshll.u32 (!%p138_p2), %s723_s16, 6 }
  0x27   : > { %s144_s22 = scalar_lea.sflag (!%p138_p2), [#allocation3], %s723_s16  ;;  %s147_s23 = scalar_lea.vmem (!%p138_p2), [#allocation2], %s434_s17 }
  0x2b   : > { %592 = dma.done.wait (%p686_p8), %s144_s22, 1024  }
  0x2c   : > { %594 = vsyncadd (%p686_p8), %s144_s22, 4294966272  ;;  %v172_v0 = vld [vmem:[%s147_s23 + $0x10] sm:$0xff]  ;;  %v170_v1 = vld [vmem:[%s147_s23] sm:$0xff]  ;;  %vm306_vm0 = vcmask 130048   ;;  %s165_s18 = scalar_lea.vmem [#allocation5], %s434_s17  ;;  %s445_s25 = sshll.u32 %s613_s9, 10 }
  0x2d   : > { %210 = vxpose.xlu1.b32.start [1/2] (short) (narrow) %v172_v0, 16  ;;  %178 = vxpose.xlu0.b32.start [1/2] (short) (narrow) %v170_v1, 16  ;;  %v173_v2 = vld [vmem:[%s147_s23 + $0x18] sm:$0xff]  ;;  %v171_v3 = vld [vmem:[%s147_s23 + $0x8] sm:$0xff]  ;;  %v176_v4 = vld [vmem:[%s147_s23 + $0x30] sm:$0xff]  ;;  %s333_s24 = sshll.u32 %s165_s18, 4  ;;  %s743_s28 = scalar_lea.hbm %s794_s1, %s445_s25  ;;  %s736_s24 = int_to_ptr.vmem [resolvable:$true] %s333_s24 }
  0x2e   : > { %v174_v5 = vld [vmem:[%s147_s23 + $0x20] sm:$0xff]  ;;  %v177_v6 = vld [vmem:[%s147_s23 + $0x38] sm:$0xff]  ;;  %v175_v7 = vld [vmem:[%s147_s23 + $0x28] sm:$0xff]  ;;  %s316_s9 = scalar_lea.sflag [#allocation4], %s723_s16  ;;  %s541_s29 = scalar_lea.vmem %s736_s24, 1024 }
  0x2f   : > { %p542_p8 = scmp.ne.s32.totalorder %s736_s24, %s541_s29  ;;  %s626_s30 = smov [#allocation5]  }
  0x30   : > { %s545_s2 = sshll.u32 %s626_s30, 4  ;;  %s546_s2 = int_to_ptr.vmem [resolvable:$false] %s545_s2 }
  0x31   : > { %211 = vxpose.xlu1.b32.end [2/2] (short) (narrow) %v173_v2, 16  ;;  %179 = vxpose.xlu0.b32.end [2/2] (short) (narrow) %v171_v3, 16  ;;  %p543_p12 = pnand %p542_p8, %p690_p9  ;;  %s547_s3 = scalar_lea.vmem %s546_s2, 2048 }
  0x32   : > { %p548_p1 = scmp.lt.s32.totalorder %s736_s24, %s546_s2  ;;  %p549_p3 = scmp.lt.s32.totalorder %s547_s3, %s541_s29 }
  0x33   : > { %p544_p0 = pneg %p543_p12 }
  0x34   : > { %p550_p5 = por %p549_p3, %p548_p1 }
  0x35   : > { %274 = vxpose.xlu1.b32.start [1/2] (short) (narrow) %v176_v4, 16  ;;  %242 = vxpose.xlu0.b32.start [1/2] (short) (narrow) %v174_v5, 16 }
  0x36   : > { %p551_p6 = pnand %p550_p5, %p544_p0 }
  0x39   : > { %275 = vxpose.xlu1.b32.end [2/2] (short) (narrow) %v177_v6, 16  ;;  %243 = vxpose.xlu0.b32.end [2/2] (short) (narrow) %v175_v7, 16 }
  0xa9   : > { %v226_v8 = vpop.trf.xlu1  ;;  %v194_v9 = vpop.trf.xlu0 }
  0xaa   : > { %309 = vst.msk [vmem:[%s165_s18 + $0x10] sm:$0xff] %vm306_vm0, %v226_v8  ;;  %307 = vst.msk [vmem:[%s165_s18] sm:$0xff] %vm306_vm0, %v194_v9 }
  0xad   : > { %v227_v10 = vpop.trf.xlu1  ;;  %v195_v11 = vpop.trf.xlu0 }
  0xae   : > { %310 = vst.msk [vmem:[%s165_s18 + $0x18] sm:$0xff] %vm306_vm0, %v227_v10  ;;  %308 = vst.msk [vmem:[%s165_s18 + $0x8] sm:$0xff] %vm306_vm0, %v195_v11 }
  0xb1   : > { %v290_v12 = vpop.trf.xlu1  ;;  %v258_v13 = vpop.trf.xlu0 }
  0xb2   : > { %313 = vst.msk [vmem:[%s165_s18 + $0x30] sm:$0xff] %vm306_vm0, %v290_v12  ;;  %311 = vst.msk [vmem:[%s165_s18 + $0x20] sm:$0xff] %vm306_vm0, %v258_v13 }
  0xb5   : > { %v291_v14 = vpop.trf.xlu1  ;;  %v259_v15 = vpop.trf.xlu0 }
  0xb6   : > { %314 = vst.msk [vmem:[%s165_s18 + $0x38] sm:$0xff] %vm306_vm0, %v291_v14  ;;  %312 = vst.msk [vmem:[%s165_s18 + $0x28] sm:$0xff] %vm306_vm0, %v259_v15 }
  0xb7   : > { %554 = shalt.err (!%p551_p6)
}
  0xb8   : > { %s555_s4 = scalar_lea.hbm %s743_s28, 1024  ;;  %s559_s13 = scalar_lea.hbm %s794_s1, 2048 }
  0xb9   : > { %p556_p7 = scmp.ne.s32.totalorder %s743_s28, %s555_s4  ;;  %p560_p13 = scmp.lt.s32.totalorder %s743_s28, %s794_s1 }
  0xba   : > { %p561_p2 = scmp.lt.s32.totalorder %s559_s13, %s555_s4 }
  0xbb   : > { %p557_p10 = pnand %p556_p7, %p690_p9 }
  0xbc   : > { %p562_p8 = por %p561_p2, %p560_p13 }
  0xbd   : > { %p558_p4 = pneg %p557_p10 }
  0xbf   : > { %p563_p12 = pnand %p562_p8, %p558_p4 }
  0xc1   : > { %566 = shalt.err (!%p563_p12)
}
  0xc2   : > { %s627_s22 = smov 128   ;;  %s628_s23 = smov 8  }
  0xc3   : > { %448 = dma.vmem_to_hbm [thread:$0]  (%p690_p9), %s736_s24, 1024, %s743_s28, %s316_s9, %s627_s22, %s627_s22, %s628_s23  }
  0xc4 PF: > { %s348_s18 = sand.u32 1, %s601_s6   ;;  %p800_p0 = scmp.ge.s32.totalorder %s621_s11, 2 }
  0xc5   : > { %s349_s25 = scalar_lea.sflag [#allocation4], %s348_s18 }
  0xc6   : > { %p455_p1 = pnand %p800_p0, %p697_p11 }
  0xc8   : > { %p456_p3 = pneg %p455_p1 }
  0xca   : > { %596 = dma.done.wait (%p456_p3), %s349_s25, 1024  }
  0xcb   : > { %598 = vsyncadd (%p456_p3), %s349_s25, 4294966272  ;;  %s17_s11 = sadd.s32 1, %s621_s11   ;;  %s801_s6 = smov %s605_s7 }
  0xcc   : > { %p14_p5 = scmp.ge.s32.totalorder %s17_s11, 4   ;;  %s802_s7 = smov %s609_s8 }
  0xcd   : > { %s803_s8 = smov %s695_s20  ;;  %s804_s9 = smov %s617_s10 }
  0xce   : > { %s805_s10 = smov %s807_s14  ;;  %16 = sbr.rel (!%p14_p5) target bundleno = 6 (0x6), region = 69 }
  0xd3   :  { %354 = vsyncpa [#allocation3], 1 }
  0xd4   :  { %356 = vsyncpa [#allocation3 + $0x1], 1 }
  0xd5   :  { %357 = vsyncpa [#allocation4], 1 }
  0xd6   :  { %359 = vsyncpa [#allocation4 + $0x1], 1 }

</bundles_post_ra>
